<compile_context>
chip_gen: v6e
topology: v6e:2x2x1
jax: 0.10.0
libtpu: 0.0.40
codegen_flags: <defaults>
</compile_context>

<pallas_src>
import math

import jax
import jax.numpy as jnp
from jax.experimental import pallas as pl
from jax.experimental.pallas import tpu as pltpu


# ----------------------------- kernels -------------------------------------


def _pe_add_kernel(scale_ref, x_ref, pe_ref, o_ref):
    # scale lives in SMEM; x/pe/out tiles in VMEM.
    s = scale_ref[0]
    # pe tile is (TR, L); x tile is (B, TR, L).  Broadcasting over the leading
    # batch axis is free (no cross-sublane/lane relayout), and scale is folded
    # into pe once per tile in f32.
    o_ref[...] = (x_ref[...] + s * pe_ref[...]).astype(o_ref.dtype)


def _pe_add_dropout_kernel(scale_ref, x_ref, pe_ref, keep_ref, o_ref):
    s = scale_ref[0]
    y = x_ref[...] + s * pe_ref[...]
    # keep_ref holds 0.0 or 1/(1-p) (inverted dropout), precomputed in f32,
    # so the training branch adds exactly one VPU multiply per element.
    o_ref[...] = (y * keep_ref[...]).astype(o_ref.dtype)


# ----------------------------- glue / wrapper -------------------------------


def make_sinusoidal_pe(max_len: int, d_model: int) -> jnp.ndarray:
    """Deterministic sinusoidal table, identical to the PyTorch __init__."""
    position = jnp.arange(max_len, dtype=jnp.float32)[:, None]            # (L, 1)
    div_term = jnp.exp(
        jnp.arange(0, d_model, 2, dtype=jnp.float32) * (-math.log(10000.0) / d_model)
    )                                                                      # (D/2,)
    pe = jnp.zeros((max_len, d_model), dtype=jnp.float32)
    pe = pe.at[:, 0::2].set(jnp.sin(position * div_term))
    pe = pe.at[:, 1::2].set(jnp.cos(position * div_term))
    return pe                                                              # (L, D)


def _round_up(a: int, b: int) -> int:
    return (a + b - 1) // b * b


def _choose_row_tile(num_rows, batch, lanes, itemsize,
                     target_bytes=2 * 1024 * 1024):
    """Rows per tile: ~target_bytes for the x tile, multiple of 8 sublanes."""
    bytes_per_row = max(batch * lanes * itemsize, 1)
    rows = max(8, (target_bytes // bytes_per_row) // 8 * 8)
    if rows >= num_rows:
        # Whole array fits one tile.  Still try to get >= 2 grid steps so the
        # DMA pipeline (and v7x's second TensorCore) has work to overlap.
        if num_rows >= 16:
            return max(8, (num_rows // 2) // 8 * 8)
        return num_rows
    return rows


def positional_encoding(x, pe, scale, *, p=0.1, training=False, rng_key=None,
                        target_tile_bytes=2 * 1024 * 1024):
    """x: (S, B, D); pe: (max_len, D) sinusoidal table; scale: (1,) f32.

    Note: callers that already hold batch-first activations can skip the
    (S,B,D)->(B,S,D) transpose below; the lane fold itself is a free reshape.
    Pass a fresh `rng_key` per training step (dropout mask is derived from it).
    """
    S, B, D = x.shape
    assert pe.shape[0] >= S and pe.shape[1] == D

    # Lane-dense folding: fold k consecutive positions into the lane dim.
    k = 128 // D if (D < 128 and 128 % D == 0) else 1
    L = k * D
    itemsize = jnp.dtype(x.dtype).itemsize

    R = pl.cdiv(S, k)                                  # folded rows (pre-pad)
    TR = _choose_row_tile(R, B, L, itemsize, target_tile_bytes)
    R_pad = _round_up(R, TR)
    S_pad = R_pad * k
    grid = (R_pad // TR,)

    pe_s = pe[:S].astype(jnp.float32)
    if S_pad != S:
        x = jnp.pad(x, ((0, S_pad - S), (0, 0), (0, 0)))
        pe_s = jnp.pad(pe_s, ((0, S_pad - S), (0, 0)))

    # Layout plumbing (plain XLA): batch-major + lane fold.
    x_f = jnp.transpose(x, (1, 0, 2)).reshape(B, R_pad, L)   # (B, R_pad, L)
    pe_f = pe_s.reshape(R_pad, L)                            # (R_pad, L)
    scale = jnp.asarray(scale, dtype=jnp.float32).reshape((1,))

    x_spec = pl.BlockSpec((B, TR, L), lambda r: (0, r, 0))
    pe_spec = pl.BlockSpec((TR, L), lambda r: (r, 0))

    operands = [scale, x_f, pe_f]
    in_specs = [pl.BlockSpec(memory_space=pltpu.MemorySpace.SMEM), x_spec, pe_spec]
    kernel = _pe_add_kernel

    use_dropout = bool(training) and float(p) > 0.0
    keep_bytes = 0
    if use_dropout:
        if rng_key is None:
            rng_key = jax.random.PRNGKey(0)
        inv_keep = 1.0 / (1.0 - float(p))
        keep = (jax.random.uniform(rng_key, (B, R_pad, L), dtype=jnp.float32)
                >= float(p)).astype(jnp.float32) * inv_keep   # 0.0 or 1/(1-p)
        operands.append(keep)
        in_specs.append(pl.BlockSpec((B, TR, L), lambda r: (0, r, 0)))
        kernel = _pe_add_dropout_kernel
        keep_bytes = B * TR * L * 4

    # VMEM budget: (x tile + out tile + pe tile [+ mask tile]) * 2 pipeline
    # buffers + slack, clamped well inside v7x's 64 MiB physical VMEM.
    tile_bytes = B * TR * L * itemsize
    pe_tile_bytes = TR * L * 4
    vmem_needed = 2 * (2 * tile_bytes + pe_tile_bytes + keep_bytes) + (2 << 20)
    vmem_limit = int(min(48 * 1024 * 1024, max(vmem_needed, 16 * 1024 * 1024)))

    out_f = pl.pallas_call(
        kernel,
        out_shape=jax.ShapeDtypeStruct((B, R_pad, L), x.dtype),
        grid=grid,
        in_specs=in_specs,
        out_specs=x_spec,
        compiler_params=pltpu.CompilerParams(
            dimension_semantics=("parallel",),
            vmem_limit_bytes=vmem_limit,
        ),
    )(*operands)

    # Undo the layout plumbing and drop any sequence padding.
    out = jnp.transpose(out_f.reshape(B, S_pad, D), (1, 0, 2))
    return out[:S]


# ----------------------------- self-test ------------------------------------


if __name__ == "__main__":
    d_model = 32
    max_len = 1024
    S, B = 8, 2

    key = jax.random.PRNGKey(0)
    x = jax.random.normal(key, (S, B, d_model), dtype=jnp.float32)

    # Parameters initialized exactly as in the module's __init__.
    scale = jnp.ones((1,), dtype=jnp.float32)          # nn.Parameter(torch.ones(1))
    pe = make_sinusoidal_pe(max_len, d_model)          # registered buffer

    # --- eval-mode forward (dropout = identity), module-sized small shape ----
    out = jax.block_until_ready(
        positional_encoding(x, pe, scale, p=0.1, training=False))
    expected = x + scale[0] * pe[:S][:, None, :]
    assert out.shape == x.shape and out.dtype == x.dtype
    assert jnp.allclose(out, expected, atol=1e-6, rtol=1e-6)

    # --- larger shape exercising a multi-step grid and the D >= 128 path -----
    S2, B2, D2 = 256, 4, 128
    x2 = jax.random.normal(jax.random.PRNGKey(1), (S2, B2, D2), dtype=jnp.float32)
    pe2 = make_sinusoidal_pe(max_len, D2)
    out2 = jax.block_until_ready(
        positional_encoding(x2, pe2, scale, p=0.1, training=False))
    exp2 = x2 + scale[0] * pe2[:S2][:, None, :]
    assert jnp.allclose(out2, exp2, atol=1e-5, rtol=1e-5)

    # --- ragged sequence length exercising the pad / slice path --------------
    S3 = 50
    x3 = jax.random.normal(jax.random.PRNGKey(2), (S3, B, d_model), dtype=jnp.float32)
    out3 = jax.block_until_ready(
        positional_encoding(x3, pe, scale, p=0.1, training=False))
    exp3 = x3 + scale[0] * pe[:S3][:, None, :]
    assert jnp.allclose(out3, exp3, atol=1e-6, rtol=1e-6)

    # --- training-mode dropout path -------------------------------------------
    out_t = jax.block_until_ready(
        positional_encoding(x, pe, scale, p=0.1, training=True,
                            rng_key=jax.random.PRNGKey(123)))
    assert out_t.shape == x.shape and out_t.dtype == x.dtype
    # Every element must be either 0 (dropped) or expected / (1 - p) (kept).
    kept = jnp.isclose(out_t, expected / (1.0 - 0.1), atol=1e-5, rtol=1e-5)
    dropped = jnp.isclose(out_t, 0.0, atol=1e-6)
    assert bool(jnp.all(kept | dropped))

    print("KERNEL_OK")
</pallas_src>

<mosaic_0001>
module attributes {stable_mosaic.version = 11 : i64} {
  func.func @_pe_add_kernel(%arg0: i32, %arg1: memref<1xf32, #tpu.memory_space<smem>>, %arg2: memref<2x2x128xf32, #tpu.memory_space<vmem>>, %arg3: memref<2x128xf32, #tpu.memory_space<vmem>>, %arg4: memref<2x2x128xf32, #tpu.memory_space<vmem>>) attributes {dimension_semantics = [#tpu.dimension_semantics<parallel>], iteration_bounds = array<i64: 1>, scalar_prefetch = 0 : i64, scratch_operands = 0 : i64, tpu.core_type = #tpu.core_type<tc>, window_params = [{transform_indices = @transform_0, window_bounds = array<i64: 1>}, {transform_indices = @transform_1, window_bounds = array<i64: 2, 2, 128>}, {transform_indices = @transform_2, window_bounds = array<i64: 2, 128>}, {transform_indices = @transform_3, window_bounds = array<i64: 2, 2, 128>}]} {
    %c0 = arith.constant 0 : index
    %0 = memref.load %arg1[%c0] : memref<1xf32, #tpu.memory_space<smem>>
    %c0_0 = arith.constant 0 : index
    %c0_1 = arith.constant 0 : index
    %c0_2 = arith.constant 0 : index
    %1 = vector.load %arg2[%c0_0, %c0_1, %c0_2] : memref<2x2x128xf32, #tpu.memory_space<vmem>>, vector<2x2x128xf32>
    %c0_3 = arith.constant 0 : index
    %c0_4 = arith.constant 0 : index
    %2 = vector.load %arg3[%c0_3, %c0_4] : memref<2x128xf32, #tpu.memory_space<vmem>>, vector<2x128xf32>
    %3 = vector.broadcast %0 : f32 to vector<2x128xf32>
    %4 = arith.mulf %3, %2 : vector<2x128xf32>
    %5 = vector.shape_cast %4 : vector<2x128xf32> to vector<1x2x128xf32>
    %6 = vector.broadcast %5 : vector<1x2x128xf32> to vector<2x2x128xf32>
    %7 = arith.addf %1, %6 : vector<2x2x128xf32>
    %c0_5 = arith.constant 0 : index
    %c0_6 = arith.constant 0 : index
    %c0_7 = arith.constant 0 : index
    %8 = vector.load %arg4[%c0_5, %c0_6, %c0_7] : memref<2x2x128xf32, #tpu.memory_space<vmem>>, vector<2x2x128xf32>
    tpu.vector_store %arg4[%c0_5, %c0_6, %c0_7], %7 {strides = array<i32>} : memref<2x2x128xf32, #tpu.memory_space<vmem>>, vector<2x2x128xf32>,
    return
  }
  func.func @transform_0(%arg0: i32) -> i32 {
    %c0_i32 = arith.constant 0 : i32
    %c0_i32_0 = arith.constant 0 : i32
    return %c0_i32 : i32
  }
  func.func @transform_1(%arg0: i32) -> (i32, i32, i32) {
    %c0_i32 = arith.constant 0 : i32
    %c0_i32_0 = arith.constant 0 : i32
    %c0_i32_1 = arith.constant 0 : i32
    return %c0_i32, %arg0, %c0_i32_0 : i32, i32, i32
  }
  func.func @transform_2(%arg0: i32) -> (i32, i32) {
    %c0_i32 = arith.constant 0 : i32
    %c0_i32_0 = arith.constant 0 : i32
    return %arg0, %c0_i32 : i32, i32
  }
  func.func @transform_3(%arg0: i32) -> (i32, i32, i32) {
    %c0_i32 = arith.constant 0 : i32
    %c0_i32_0 = arith.constant 0 : i32
    %c0_i32_1 = arith.constant 0 : i32
    return %c0_i32, %arg0, %c0_i32_0 : i32, i32, i32
  }
}

</mosaic_0001>

<bundles_post_ra>
// kernel: tpu_custom_call.1
= control target key start
LH: loop header
LB: loop body
LE: loop exit
PB: predicated region body
PF: predicated region fallthrough
CT: control target
= control target key end

     0   :  { %9 = vsyncpa [#allocation4], 0  ;;  %s141_s0 = inlined_call_operand.<no memory space> [shape: f32[1], index: 0, kind: input, shape index: {}]   ;;  %s142_s1 = inlined_call_operand.hbm [shape: f32[2,2,128], index: 1, kind: input, shape index: {}]   ;;  %s143_s2 = inlined_call_operand.vmem [shape: f32[2,128], index: 2, kind: input, shape index: {}]   ;;  %s144_s3 = inlined_call_operand.hbm [shape: f32[2,2,128], index: 3, kind: output, shape index: {}]  }
   0x1   :  { %10 = vsyncpa [#allocation5], 0  ;;  %s105_s12 = smov [#allocation3]  }
   0x2   :  { %s18_s13 = sshll.u32 %s105_s12, 4  ;;  %s19_s13 = int_to_ptr.vmem [resolvable:$true] %s18_s13 }
   0x3   :  { %s69_s14 = scalar_lea.vmem %s19_s13, 64  ;;  %p74_p1 = scmp.lt.s32.totalorder %s19_s13, %s19_s13 }
   0x4   :  { %p70_p0 = scmp.ne.s32.totalorder %s19_s13, %s69_s14  ;;  %p75_p2 = scmp.lt.s32.totalorder %s69_s14, %s69_s14 }
   0x6   :  { %p76_p3 = por %p75_p2, %p74_p1 }
   0x8   :  { %p77_p4 = pnand %p76_p3, %p70_p0 }
   0xa   :  { %80 = shalt.err (!%p77_p4)
}
   0xb   :  { %s106_s15 = smov 32   ;;  %s107_s16 = smov 2  }
   0xc   :  { %24 = dma.hbm_to_vmem [thread:$0]  %s142_s1, 64, %s19_s13, [#allocation4], %s106_s15, %s106_s15, %s107_s16  }
   0xd   :  { %101 = dma.done.wait [#allocation4], 64  }
   0xe   :  { %102 = vsyncadd [#allocation4], 4294967232  ;;  %v34_v0 = vstv %s141_s0  ;;  %s108_s21 = smov [#allocation6]   ;;  %v31_v1 = vld [vmem:[#allocation3] sm:$0x3] }
   0xf   :  { %s45_s22 = sshll.u32 %s108_s21, 4  ;;  %v33_v2 = vld [vmem:[%s143_s2] sm:$0x3]  ;;  %v32_v3 = vld [vmem:[#allocation3 + $0x2] sm:$0x3]  ;;  %s46_s22 = int_to_ptr.vmem [resolvable:$true] %s45_s22 }
  0x10   :  { %v35_v4 = vmul.f32 %v34_v0, %v33_v2  ;;  %s81_s1 = scalar_lea.vmem %s46_s22, 64  ;;  %p86_p6 = scmp.lt.s32.totalorder %s46_s22, %s46_s22 }
  0x11   :  { %p82_p5 = scmp.ne.s32.totalorder %s46_s22, %s81_s1  ;;  %p87_p7 = scmp.lt.s32.totalorder %s81_s1, %s81_s1 }
  0x12   :  { %v36_v5 = vadd.f32 %v35_v4, %v31_v1  ;;  %v37_v6 = vadd.f32 %v35_v4, %v32_v3 }
  0x13   :  { %p88_p8 = por %p87_p7, %p86_p6 }
  0x14   :  { %38 = vst [vmem:[#allocation6] sm:$0x3] %v36_v5  ;;  %39 = vst [vmem:[#allocation6 + $0x2] sm:$0x3] %v37_v6 }
  0x15   :  { %p89_p9 = pnand %p88_p8, %p82_p5 }
  0x17   :  { %92 = shalt.err (!%p89_p9)
}
  0x18   :  { %51 = dma.vmem_to_hbm [thread:$0]  %s46_s22, 64, %s144_s3, [#allocation5], %s106_s15, %s106_s15, %s107_s16  }
  0x19   :  { %103 = dma.done.wait [#allocation5], 64  }
  0x1a   :  { %104 = vsyncadd [#allocation5], 4294967232 }
  0x1b   :  { %55 = vsyncpa [#allocation4], 1 }
  0x1c   :  { %56 = vsyncpa [#allocation5], 1 }

</bundles_post_ra>
